<compile_context>
chip_gen: v5e
topology: v5e:2x2
jax: 0.10.0
libtpu: 0.0.40
codegen_flags: <defaults>
</compile_context>

<pallas_src>
import jax
import jax.numpy as jnp
from jax import lax
from jax.experimental import pallas as pl
from jax.experimental.pallas import tpu as pltpu


def _round_up(x: int, m: int) -> int:
    return ((x + m - 1) // m) * m


def _vmem_budget_and_limit():
    """(tile-selection budget, vmem_limit_bytes) derived from physical VMEM."""
    try:
        phys = int(pltpu.get_tpu_info().vmem_capacity_bytes)
        if not (16 * 1024 * 1024 <= phys <= 1024 * 1024 * 1024):
            phys = 64 * 1024 * 1024
    except Exception:
        phys = 64 * 1024 * 1024          # safe fallback: v5e/v6e=128 MiB, v7x=64 MiB
    budget = min(int(phys * 0.55), 96 * 1024 * 1024)
    limit = min(phys - 8 * 1024 * 1024, budget + 16 * 1024 * 1024)
    return budget, limit


def mbar_loss_pallas(energy, bias, mask, count, *, tile_m=1024):
    """energy: (N, K); bias/mask/count: (K,). Returns the scalar mbar loss."""
    N, K = energy.shape
    f32 = jnp.float32

    bias_row = bias.astype(f32).reshape(1, K)     # K elements: negligible wrapper work
    mask_row = mask.astype(f32).reshape(1, K)

    # ---- row-tile size from a generation-aware, intermediate-aware VMEM budget
    budget, vmem_limit = _vmem_budget_and_limit()
    esize = jnp.dtype(energy.dtype).itemsize
    # double-buffered energy block + ~2 f32 elementwise intermediates per element
    per_row = K * (2 * esize + 8) + 64
    fixed = 2 * 2 * K * 4 * 2 + 2 * 8 * 128 * 4 + (1 << 20)   # bias/mask, out, slack
    usable = max(budget - fixed, 8 * per_row)
    max_rows = max(8, (usable // per_row) // 8 * 8)
    tile_m = max(8, (min(tile_m, max_rows, _round_up(N, 8)) // 8) * 8)

    num_tiles = int(pl.cdiv(N, tile_m))
    last = num_tiles - 1
    has_tail = (N % tile_m) != 0

    def kernel(e_ref, b_ref, m_ref, out_ref):
        i = pl.program_id(0)
        e = e_ref[...].astype(f32)                               # (tile_m, K)
        x = jnp.exp(-(e + b_ref[...]))                           # EUP, matches reference
        rs = jnp.sum(x * m_ref[...], axis=-1, keepdims=True)     # (tile_m, 1) VPU+XLU

        def emit(rs_val):
            part = jnp.sum(jnp.log(rs_val), axis=0, keepdims=True)        # (1, 1)
            out_ref[...] = jnp.broadcast_to(part, (8, 128)).reshape(1, 8, 128)

        if not has_tail:
            emit(rs)
        else:
            @pl.when(i != last)
            def _full():
                emit(rs)

            @pl.when(i == last)
            def _tail():
                row = i * tile_m + lax.broadcasted_iota(jnp.int32, (tile_m, 1), 0)
                emit(jnp.where(row < N, rs, f32(1.0)))           # OOB rows -> log(1)=0

        # TODO(synk): on v7x (EUP-bound at small K) the per-row log runs on
        # lane-sparse (tile_m, 1) vregs; a lane-dense repack (one 128x128 XLU
        # transpose per 128-row group) would roughly halve EUP work for K<=128.

    partials = pl.pallas_call(
        kernel,
        out_shape=jax.ShapeDtypeStruct((num_tiles, 8, 128), f32),
        grid_spec=pltpu.PrefetchScalarGridSpec(
            num_scalar_prefetch=0,
            grid=(num_tiles,),
            in_specs=[
                pl.BlockSpec((tile_m, K), lambda i: (i, 0)),   # energy row tile (K = full extent)
                pl.BlockSpec((1, K), lambda i: (0, 0)),        # bias row (constant index -> fetched once)
                pl.BlockSpec((1, K), lambda i: (0, 0)),        # mask row (constant index -> fetched once)
            ],
            out_specs=pl.BlockSpec((1, 8, 128), lambda i: (i, 0, 0)),
        ),
        compiler_params=pltpu.CompilerParams(
            dimension_semantics=("parallel",),
            vmem_limit_bytes=int(vmem_limit),
        ),
    )(energy, bias_row, mask_row)

    # each partial block holds one per-tile scalar replicated over (8, 128)
    t1 = jnp.sum(partials[:, 0, 0])
    t2 = jnp.sum(count.astype(f32) * bias.astype(f32))        # K elements: plain XLA
    return ((t1 + t2) / f32(N)).astype(energy.dtype)


def mbar_loss_ref(energy, bias, mask, count):
    n = energy.shape[0]
    tmp = energy + bias[None, :]
    t1 = jnp.sum(jnp.log(jnp.sum(jnp.exp(-tmp) * mask[None, :], axis=-1)))
    t2 = jnp.sum(count * bias)
    return (t1 + t2) / n


if __name__ == "__main__":
    key = jax.random.PRNGKey(0)

    def make_inputs(k, n, kk):
        k_e, k_b, k_c, k_m = jax.random.split(k, 4)
        energy = jax.random.normal(k_e, (n, kk), dtype=jnp.float32)
        cnt = jnp.abs(jax.random.normal(k_c, (kk,), dtype=jnp.float32)) * 4.0
        msk = (jax.random.uniform(k_m, (kk,)) > 0.2).astype(jnp.float32)
        b = jax.random.normal(k_b, (kk,), dtype=jnp.float32) * msk   # masked, as in __init__
        return energy, b, msk, cnt

    k1, k2 = jax.random.split(key)

    # Small shape consistent with the module: num_samples=16, num_states=32.
    energy, bias, mask, cnt = make_inputs(k1, 16, 32)
    loss = jax.block_until_ready(mbar_loss_pallas(energy, bias, mask, cnt))
    loss_ref = jax.block_until_ready(mbar_loss_ref(energy, bias, mask, cnt))
    assert jnp.allclose(loss, loss_ref, rtol=1e-5, atol=1e-5), (loss, loss_ref)

    # Irregular shape: exercises non-128 K, the OOB row tail mask and tile clamping.
    energy, bias, mask, cnt = make_inputs(k2, 203, 50)
    loss = jax.block_until_ready(mbar_loss_pallas(energy, bias, mask, cnt))
    loss_ref = jax.block_until_ready(mbar_loss_ref(energy, bias, mask, cnt))
    assert jnp.allclose(loss, loss_ref, rtol=1e-5, atol=1e-5), (loss, loss_ref)

    print("KERNEL_OK")
</pallas_src>

<mosaic_0001>
module attributes {stable_mosaic.version = 11 : i64} {
  func.func @kernel(%arg0: i32, %arg1: memref<16x32xf32, #tpu.memory_space<vmem>>, %arg2: memref<1x32xf32, #tpu.memory_space<vmem>>, %arg3: memref<1x32xf32, #tpu.memory_space<vmem>>, %arg4: memref<1x8x128xf32, #tpu.memory_space<vmem>>) attributes {dimension_semantics = [#tpu.dimension_semantics<parallel>], iteration_bounds = array<i64: 1>, scalar_prefetch = 0 : i64, scratch_operands = 0 : i64, tpu.core_type = #tpu.core_type<tc>, window_params = [{transform_indices = @transform_0, window_bounds = array<i64: 16, 32>}, {pipeline_mode = #tpu.pipeline_mode<synchronous>, transform_indices = @transform_1, window_bounds = array<i64: 1, 32>}, {pipeline_mode = #tpu.pipeline_mode<synchronous>, transform_indices = @transform_2, window_bounds = array<i64: 1, 32>}, {transform_indices = @transform_3, window_bounds = array<i64: 1, 8, 128>}]} {
    %c0 = arith.constant 0 : index
    %c0_0 = arith.constant 0 : index
    %0 = vector.load %arg1[%c0, %c0_0] : memref<16x32xf32, #tpu.memory_space<vmem>>, vector<16x32xf32>
    %c0_1 = arith.constant 0 : index
    %c0_2 = arith.constant 0 : index
    %1 = vector.load %arg2[%c0_1, %c0_2] : memref<1x32xf32, #tpu.memory_space<vmem>>, vector<1x32xf32>
    %2 = vector.broadcast %1 : vector<1x32xf32> to vector<16x32xf32>
    %3 = arith.addf %0, %2 : vector<16x32xf32>
    %cst = arith.constant 0.000000e+00 : f32
    %4 = vector.broadcast %cst : f32 to vector<16x32xf32>
    %5 = arith.subf %4, %3 : vector<16x32xf32>
    %6 = math.exp %5 : vector<16x32xf32>
    %c0_3 = arith.constant 0 : index
    %c0_4 = arith.constant 0 : index
    %7 = vector.load %arg3[%c0_3, %c0_4] : memref<1x32xf32, #tpu.memory_space<vmem>>, vector<1x32xf32>
    %8 = vector.broadcast %7 : vector<1x32xf32> to vector<16x32xf32>
    %9 = arith.mulf %6, %8 : vector<16x32xf32>
    %cst_5 = arith.constant dense<0.000000e+00> : vector<16xf32>
    %10 = vector.multi_reduction <add>, %9, %cst_5 [1] : vector<16x32xf32> to vector<16xf32>
    %11 = vector.shape_cast %10 : vector<16xf32> to vector<16x1xf32>
    %12 = math.log %11 : vector<16x1xf32>
    %cst_6 = arith.constant dense<0.000000e+00> : vector<1xf32>
    %13 = vector.multi_reduction <add>, %12, %cst_6 [0] : vector<16x1xf32> to vector<1xf32>
    %14 = vector.shape_cast %13 : vector<1xf32> to vector<1x1xf32>
    %15 = vector.shape_cast %14 : vector<1x1xf32> to vector<1x1xf32>
    %16 = vector.broadcast %15 : vector<1x1xf32> to vector<8x128xf32>
    %17 = vector.shape_cast %16 : vector<8x128xf32> to vector<1x8x128xf32>
    %c0_7 = arith.constant 0 : index
    %c0_8 = arith.constant 0 : index
    %c0_9 = arith.constant 0 : index
    %18 = vector.load %arg4[%c0_7, %c0_8, %c0_9] : memref<1x8x128xf32, #tpu.memory_space<vmem>>, vector<1x8x128xf32>
    tpu.vector_store %arg4[%c0_7, %c0_8, %c0_9], %17 {strides = array<i32>} : memref<1x8x128xf32, #tpu.memory_space<vmem>>, vector<1x8x128xf32>,
    return
  }
  func.func @transform_0(%arg0: i32) -> (i32, i32) {
    %c0_i32 = arith.constant 0 : i32
    %c0_i32_0 = arith.constant 0 : i32
    return %arg0, %c0_i32 : i32, i32
  }
  func.func @transform_1(%arg0: i32) -> (i32, i32) {
    %c0_i32 = arith.constant 0 : i32
    %c0_i32_0 = arith.constant 0 : i32
    %c0_i32_1 = arith.constant 0 : i32
    return %c0_i32, %c0_i32_0 : i32, i32
  }
  func.func @transform_2(%arg0: i32) -> (i32, i32) {
    %c0_i32 = arith.constant 0 : i32
    %c0_i32_0 = arith.constant 0 : i32
    %c0_i32_1 = arith.constant 0 : i32
    return %c0_i32, %c0_i32_0 : i32, i32
  }
  func.func @transform_3(%arg0: i32) -> (i32, i32, i32) {
    %c0_i32 = arith.constant 0 : i32
    %c0_i32_0 = arith.constant 0 : i32
    %c0_i32_1 = arith.constant 0 : i32
    return %arg0, %c0_i32, %c0_i32_0 : i32, i32, i32
  }
}

</mosaic_0001>

<bundles_post_ra>
// kernel: tpu_custom_call.1
= control target key start
LH: loop header
LB: loop body
LE: loop exit
PB: predicated region body
PF: predicated region fallthrough
CT: control target
= control target key end

     0   :  { %8 = vsyncpa [#allocation3], 0  ;;  %s232_s0 = inlined_call_operand.hbm [shape: f32[16,32], index: 0, kind: input, shape index: {}]   ;;  %s233_s1 = inlined_call_operand.hbm [shape: f32[1,32], index: 1, kind: input, shape index: {}]   ;;  %s234_s2 = inlined_call_operand.vmem [shape: f32[1,32], index: 2, kind: input, shape index: {}]   ;;  %s235_s3 = inlined_call_operand.hbm [shape: f32[1,8,128], index: 3, kind: output, shape index: {}]  }
   0x1   :  { %9 = vsyncpa [#allocation6], 0 }
   0x2   :  { %10 = vsyncpa [#allocation4], 0  ;;  %s15_s14 = sshll.u32 %s232_s0, 4  ;;  %s195_s15 = smov [#allocation2]   ;;  %s16_s14 = int_to_ptr.hbm [resolvable:$true] %s15_s14 }
   0x3   :  { %s17_s16 = sshll.u32 %s195_s15, 4  ;;  %s29_s19 = sshll.u32 %s233_s1, 4  ;;  %s18_s16 = int_to_ptr.vmem [resolvable:$true] %s17_s16  ;;  %s30_s19 = int_to_ptr.hbm [resolvable:$true] %s29_s19 }
   0x4   :  { %s196_s20 = smov 128   ;;  %s197_s21 = smov 8  }
   0x5   :  { %23 = dma.hbm_to_vmem [thread:$0]  %s16_s14, 256, %s18_s16, [#allocation3], %s196_s20, %s196_s20, %s197_s21  }
   0x6   :  { %s198_s22 = smov [#allocation5]  }
   0x7   :  { %s31_s23 = sshll.u32 %s198_s22, 4  ;;  %s32_s23 = int_to_ptr.vmem [resolvable:$true] %s31_s23 }
   0x8   :  { %34 = dma.hbm_to_vmem [thread:$0]  %s30_s19, 16, %s32_s23, [#allocation6]  }
   0x9   :  { %189 = dma.done.wait [#allocation3], 256  }
   0xa   :  { %190 = vsyncadd [#allocation3], 4294967040 }
   0xb   :  { %191 = dma.done.wait [#allocation6], 16  }
   0xc   :  { %192 = vsyncadd [#allocation6], 4294967280  ;;  %v45_v0 = vld [vmem:[#allocation2] sm:$0xff]  ;;  %v107_v1 = vld [vmem:[#allocation5] ss:$0 sm:$0xff]  ;;  %vm65_vm0 = vcmask 261120  }
   0xd   :  { %v46_v2 = vld [vmem:[#allocation2 + $0x8] sm:$0xff]  ;;  %v51_v3 = vadd.f32 %v107_v1, %v45_v0  ;;  %v108_v9 = vld [vmem:[%s234_s2] ss:$0 sm:$0xff]  ;;  %s199_s2 = smov [#allocation7]   ;;  %s91_s27 = sshll.u32 %s235_s3, 4  ;;  %s92_s27 = int_to_ptr.hbm [resolvable:$true] %s91_s27 }
   0xe   :  { %v52_v4 = vadd.f32 %v107_v1, %v46_v2  ;;  %s89_s24 = sshll.u32 %s199_s2, 4  ;;  %s90_s24 = int_to_ptr.vmem [resolvable:$true] %s89_s24 }
   0xf   :  { %v53_v5 = vsub.f32 0.0, %v51_v3 }
  0x10   :  { %v54_v6 = vsub.f32 0.0, %v52_v4 }
  0x11   :  { %v55_v7 = vmul.f32 1.442695, %v53_v5 }
  0x12   :  { %v57_v8 = vmul.f32 1.442695, %v54_v6 }
  0x13   :  { %109 = vpow2.f32 %v55_v7 }
  0x14   :  { %111 = vpow2.f32 %v57_v8 }
  0x19   :  { %v110_v10 = vpop.eup %109 }
  0x1a   :  { %v63_v11 = vmul.f32 %v110_v10, %v108_v9  ;;  %v112_v12 = vpop.eup %111 }
  0x1b   :  { %v64_v14 = vmul.f32 %v112_v12, %v108_v9 }
  0x1c   :  { %v66_v13 = vsel %vm65_vm0, %v63_v11, 0.0 }
  0x1d   :  { %67 = vadd.xlane.f32.xlu0 %v66_v13  ;;  %v69_v15 = vsel %vm65_vm0, %v64_v14, 0.0 }
  0x25   :  { %70 = vadd.xlane.f32.xlu0 %v69_v15 }
  0x90   :  { %v68_v16 = vpop.xlane.xlu0 %67 }
  0x91   :  { %113 = vlog2.f32 %v68_v16 }
  0x97   :  { %v114_v18 = vpop.eup %113 }
  0x98   :  { %v71_v17 = vpop.xlane.xlu0 %70  ;;  %v73_v20 = vmul.f32 0.6931472, %v114_v18 }
  0x99   :  { %115 = vlog2.f32 %v71_v17 }
  0x9f   :  { %v116_v19 = vpop.eup %115 }
  0xa0   :  { %v75_v21 = vmul.f32 0.6931472, %v116_v19 }
  0xa2   :  { %v76_v22 = vadd.f32 %v75_v21, %v73_v20 }
  0xa4   :  { %v77_v23 = vrot.slane %v76_v22, 4 }
  0xa6   :  { %v78_v24 = vadd.f32 %v77_v23, %v76_v22 }
  0xa8   :  { %v79_v25 = vrot.slane %v78_v24, 2 }
  0xaa   :  { %v80_v26 = vadd.f32 %v79_v25, %v78_v24 }
  0xac   :  { %v81_v27 = vrot.slane %v80_v26, 1 }
  0xae   :  { %v82_v28 = vadd.f32 %v81_v27, %v80_v26 }
  0xb0   :  { %83 = vst [vmem:[#allocation7] sm:$0xff] %v82_v28 }
  0xb1   :  { %94 = dma.vmem_to_hbm [thread:$0]  %s90_s24, 128, %s92_s27, [#allocation4]  }
  0xb2   :  { %193 = dma.done.wait [#allocation4], 128  }
  0xb3   :  { %194 = vsyncadd [#allocation4], 4294967168 }
  0xb4   :  { %99 = vsyncpa [#allocation3], 1 }
  0xb5   :  { %100 = vsyncpa [#allocation6], 1 }
  0xb6   :  { %101 = vsyncpa [#allocation4], 1 }

</bundles_post_ra>
